<compile_context>
chip_gen: v7x
topology: tpu7x:2x2x1
jax: 0.10.0
libtpu: 0.0.40
codegen_flags: <defaults>
</compile_context>

<pallas_src>
import functools

import jax
import jax.numpy as jnp
from jax.experimental import pallas as pl
from jax.experimental.pallas import tpu as pltpu

_LANE = 128               # TPU lane width — feature tiles are multiples of this
_SUBLANE = 8
_MXU_REDUCE_MIN_B = 256   # below this a VPU/XLU batch reduce beats a (1,B)@(B,TF) dot
_MAX_TILE_B_EVAL = 512    # batch tile for the (embarrassingly parallel) eval path


def _round_up(n, m):
    return ((n + m - 1) // m) * m


def _cdiv(a, b):
    return (a + b - 1) // b


def _vmem_capacity_bytes():
    try:
        return int(pltpu.get_tpu_info().vmem_capacity_bytes)
    except Exception:
        return 64 * 1024 * 1024   # conservative fallback (v7x-sized)


_VMEM_PHYS = _vmem_capacity_bytes()
_SMALL_VMEM = _VMEM_PHYS < (100 * 1024 * 1024)   # v7x: 64 MiB/TC; v5e/v6e: 128 MiB
if _SMALL_VMEM:
    # v7x-class: modest tiles, scoped limit <= 48 MiB, and force >= 2 parallel
    # grid steps so the second TensorCore is not idle.
    _VMEM_BUDGET = 22 * 1024 * 1024   # budget for the pipelined x/out buffers
    _VMEM_LIMIT = 48 * 1024 * 1024    # scoped VMEM limit handed to Mosaic
    _MAX_TILE_F = 512
    _SPLIT_GRID = True
else:
    # v5e/v6e: 128 MiB physical VMEM — bigger tiles, fewer grid steps.
    _VMEM_BUDGET = 48 * 1024 * 1024
    _VMEM_LIMIT = 100 * 1024 * 1024
    _MAX_TILE_F = 2048
    _SPLIT_GRID = False
# Never ask for more scoped VMEM than physically sensible (headroom for the
# compiler's internal scratch and in-kernel f32 temporaries).
_VMEM_LIMIT = min(_VMEM_LIMIT, max(_VMEM_PHYS - 16 * 1024 * 1024, 32 * 1024 * 1024))


# ----------------------------------------------------------------------------
# Tile selection
# ----------------------------------------------------------------------------

def _train_tile_cost(batch, tf, in_item, out_item, x_bufs):
    # x (x_bufs buffers) + normalized out (2 buffers) + mean/var in+out tiles.
    return (x_bufs * batch * tf * in_item
            + 2 * batch * tf * out_item
            + 8 * tf * 4)


def _pick_train_tiles(batch, feat, in_item, out_item):
    """Feature tile width + x-pipeline depth for the fused update+normalize kernel."""
    if feat <= _LANE:
        return feat, 2                       # single full-width (possibly <128) block
    f_ceil = _round_up(feat, _LANE)
    limit = min(f_ceil, _MAX_TILE_F)
    tf = _LANE
    t = _LANE
    while t <= limit:
        if _train_tile_cost(batch, t, in_item, out_item, 2) <= _VMEM_BUDGET:
            tf = t
        t += _LANE
    # TODO(synk): for very large batches even a 128-wide tile exceeds the VMEM
    # budget; that regime needs a second (batch) grid axis accumulating
    # per-feature sum / sum-of-squares in VMEM scratch (pl.when init/finalize)
    # plus a normalize sweep.  Not needed for RL-sized observation batches.
    if _SPLIT_GRID and f_ceil >= 2 * _LANE:
        # Guarantee >= 2 feature tiles so v7x's two TensorCores both get work.
        tf = min(tf, _round_up(_cdiv(feat, 2), _LANE))
    nf = _cdiv(feat, tf)
    x_bufs = 2
    if nf >= 3 and _train_tile_cost(batch, tf, in_item, out_item, 3) <= _VMEM_BUDGET:
        x_bufs = 3                           # deepen the x pipeline: per-tile chain is serial
    return tf, x_bufs


def _eval_tile_cost(tb, tf, in_item, out_item, x_bufs):
    return x_bufs * tb * tf * in_item + 2 * tb * tf * out_item + 4 * tf * 4


def _pick_eval_tiles(batch, feat, in_item, out_item):
    tb = batch if batch <= _MAX_TILE_B_EVAL else _MAX_TILE_B_EVAL
    if feat <= _LANE:
        tf = feat
    else:
        f_ceil = _round_up(feat, _LANE)
        limit = min(f_ceil, _MAX_TILE_F)
        tf = _LANE
        t = _LANE
        while t <= limit:
            if _eval_tile_cost(tb, t, in_item, out_item, 2) <= _VMEM_BUDGET:
                tf = t
            t += _LANE
        if _SPLIT_GRID and f_ceil >= 2 * _LANE and _cdiv(batch, tb) == 1:
            tf = min(tf, _round_up(_cdiv(feat, 2), _LANE))
    if (_SPLIT_GRID and _cdiv(batch, tb) * _cdiv(feat, tf) < 2
            and batch >= 2 * _SUBLANE):
        tb = _round_up(_cdiv(batch, 2), _SUBLANE)     # split batch for the 2nd TC
    nb, nf = _cdiv(batch, tb), _cdiv(feat, tf)
    x_bufs = 2
    if nb * nf >= 3 and _eval_tile_cost(tb, tf, in_item, out_item, 3) <= _VMEM_BUDGET:
        x_bufs = 3
    return tb, tf, x_bufs


def _x_block_spec(block_shape, index_map, bufs):
    """BlockSpec for the x input, optionally with a 3-deep pipeline."""
    if bufs > 2:
        try:
            return pl.BlockSpec(block_shape, index_map,
                                pipeline_mode=pl.Buffered(bufs))
        except Exception:   # older jax without pipeline_mode support
            pass
    return pl.BlockSpec(block_shape, index_map)


# ----------------------------------------------------------------------------
# Kernels
# ----------------------------------------------------------------------------

def _train_kernel(rate_ref, x_ref, mean_ref, var_ref,
                  out_ref, new_mean_ref, new_var_ref, *, eps, clip_threshold):
    """Fused experience() + normalize() for one (B, tf) feature tile.

    rate_ref : SMEM (1,) f32 -- count_x / new_count (0.0 => stats unchanged)
    x_ref    : VMEM (B, tf)  -- input batch tile (dtype of x)
    mean_ref : VMEM (1, tf) f32 / var_ref : VMEM (1, tf) f32 -- running stats
    """
    x = x_ref[...]
    xf = x.astype(jnp.float32)
    old_mean = mean_ref[...]
    old_var = var_ref[...]
    rate = rate_ref[0]
    b = x.shape[0]

    if b >= _MXU_REDUCE_MIN_B:
        # Large batches: offload the batch reduction to the (otherwise idle)
        # MXU via (1,B)@(B,tf) dots.  HIGHEST precision keeps f32 accuracy and
        # the two-pass centered form avoids E[x^2]-E[x]^2 cancellation.
        ones_over_b = jnp.full((1, b), 1.0 / b, dtype=jnp.float32)
        mean_x = jnp.dot(ones_over_b, xf,
                         preferred_element_type=jnp.float32,
                         precision=jax.lax.Precision.HIGHEST)
        centered = xf - mean_x
        var_x = jnp.dot(ones_over_b, centered * centered,
                        preferred_element_type=jnp.float32,
                        precision=jax.lax.Precision.HIGHEST)
    else:
        # Small batches: a VPU/XLU cross-sublane reduce is lower latency than
        # spinning up a padded matmul + MRF/MRB round trip.
        mean_x = jnp.mean(xf, axis=0, keepdims=True)
        centered = xf - mean_x
        var_x = jnp.mean(centered * centered, axis=0, keepdims=True)

    # Welford-style running update; rate == 0 reproduces the PyTorch
    # early-return (new stats == old stats) exactly.
    delta_mean = mean_x - old_mean
    new_mean = old_mean + rate * delta_mean
    new_var = old_var + rate * (var_x - old_var + delta_mean * (mean_x - new_mean))

    new_mean_ref[...] = new_mean
    new_var_ref[...] = new_var

    # _std_inverse = (_var + eps) ** (-0.5)
    std_inv = jax.lax.rsqrt(new_var + eps)
    if x.dtype == jnp.float32:
        y = (xf - new_mean) * std_inv
    else:
        # bf16 et al.: keep the dominant (B, tf) elementwise chain in the
        # input dtype; cast the per-feature stats down once.
        y = (x - new_mean.astype(x.dtype)) * std_inv.astype(x.dtype)
    if clip_threshold is not None:
        y = jnp.clip(y, -clip_threshold, clip_threshold)
    out_ref[...] = y.astype(out_ref.dtype)


def _eval_kernel(x_ref, mean_ref, var_ref, out_ref, *, eps, clip_threshold):
    """normalize() only (no stat update) for one (tb, tf) tile."""
    x = x_ref[...]
    mean = mean_ref[...]
    std_inv = jax.lax.rsqrt(var_ref[...] + eps)
    if x.dtype == jnp.float32:
        y = (x - mean) * std_inv
    else:
        y = (x - mean.astype(x.dtype)) * std_inv.astype(x.dtype)
    if clip_threshold is not None:
        y = jnp.clip(y, -clip_threshold, clip_threshold)
    out_ref[...] = y.astype(out_ref.dtype)


# ----------------------------------------------------------------------------
# pallas_call wrappers
# ----------------------------------------------------------------------------

def _empnorm_train(x, mean, var, rate, *, eps, clip_threshold):
    """x: (B, F); mean/var: (1, F) f32; rate: (1,) f32."""
    B, F = x.shape
    itm = x.dtype.itemsize
    tf, x_bufs = _pick_train_tiles(B, F, itm, itm)
    nf = _cdiv(F, tf)

    kernel = functools.partial(_train_kernel, eps=eps, clip_threshold=clip_threshold)
    cost = pl.CostEstimate(
        flops=int(10 * B * F),
        transcendentals=int(F),
        bytes_accessed=int(B * F * 2 * itm + 4 * F * 4))

    out, new_mean, new_var = pl.pallas_call(
        kernel,
        grid=(nf,),
        out_shape=(
            jax.ShapeDtypeStruct((B, F), x.dtype),      # normalized
            jax.ShapeDtypeStruct((1, F), jnp.float32),  # new running mean
            jax.ShapeDtypeStruct((1, F), jnp.float32),  # new running var
        ),
        in_specs=[
            pl.BlockSpec(memory_space=pltpu.SMEM),            # rate scalar
            _x_block_spec((B, tf), lambda j: (0, j), x_bufs),  # x tile
            pl.BlockSpec((1, tf), lambda j: (0, j)),           # running mean tile
            pl.BlockSpec((1, tf), lambda j: (0, j)),           # running var tile
        ],
        out_specs=(
            pl.BlockSpec((B, tf), lambda j: (0, j)),
            pl.BlockSpec((1, tf), lambda j: (0, j)),
            pl.BlockSpec((1, tf), lambda j: (0, j)),
        ),
        # Reuse the running-stat HBM buffers for the updated stats.
        input_output_aliases={2: 1, 3: 2},
        compiler_params=pltpu.CompilerParams(
            dimension_semantics=("parallel",),
            vmem_limit_bytes=_VMEM_LIMIT),
        cost_estimate=cost,
    )(rate, x, mean, var)
    return out, new_mean, new_var


def _empnorm_eval(x, mean, var, *, eps, clip_threshold):
    """Normalize-only path: no stat outputs, tiled over batch and features."""
    B, F = x.shape
    itm = x.dtype.itemsize
    tb, tf, x_bufs = _pick_eval_tiles(B, F, itm, itm)
    nb, nf = _cdiv(B, tb), _cdiv(F, tf)

    kernel = functools.partial(_eval_kernel, eps=eps, clip_threshold=clip_threshold)
    cost = pl.CostEstimate(
        flops=int(3 * B * F),
        transcendentals=int(F),
        bytes_accessed=int(B * F * 2 * itm + 2 * F * 4))

    return pl.pallas_call(
        kernel,
        grid=(nb, nf),
        out_shape=jax.ShapeDtypeStruct((B, F), x.dtype),
        in_specs=[
            _x_block_spec((tb, tf), lambda i, j: (i, j), x_bufs),
            pl.BlockSpec((1, tf), lambda i, j: (0, j)),
            pl.BlockSpec((1, tf), lambda i, j: (0, j)),
        ],
        out_specs=pl.BlockSpec((tb, tf), lambda i, j: (i, j)),
        compiler_params=pltpu.CompilerParams(
            dimension_semantics=("parallel", "parallel"),
            vmem_limit_bytes=_VMEM_LIMIT),
        cost_estimate=cost,
    )(x, mean, var)


# ----------------------------------------------------------------------------
# Jitted forward paths (rate/count bookkeeping stays on device)
# ----------------------------------------------------------------------------

@functools.partial(jax.jit, static_argnames=("eps", "clip_threshold", "until"))
def _train_forward(x, mean, var, count, *, eps, clip_threshold, until):
    batch = x.shape[0]
    if until is None:
        new_count = count + batch
        rate = jnp.asarray(batch, jnp.float32) / new_count.astype(jnp.float32)
    else:
        active = count < until                      # experience() gate
        new_count = jnp.where(active, count + batch, count)
        rate = jnp.where(
            active,
            jnp.asarray(batch, jnp.float32) / (count.astype(jnp.float32) + batch),
            jnp.asarray(0.0, jnp.float32))
    rate = rate.reshape((1,)).astype(jnp.float32)
    out, new_mean, new_var = _empnorm_train(
        x, mean, var, rate, eps=eps, clip_threshold=clip_threshold)
    return out, new_mean, new_var, new_count


@functools.partial(jax.jit, static_argnames=("eps", "clip_threshold"))
def _eval_forward(x, mean, var, *, eps, clip_threshold):
    return _empnorm_eval(x, mean, var, eps=eps, clip_threshold=clip_threshold)


# ----------------------------------------------------------------------------
# Module wrapper
# ----------------------------------------------------------------------------

class EmpiricalNormalizationPallas:
    """JAX/Pallas port of the PyTorch EmpiricalNormalization module
    (batch_axis=0, 1-D feature shape).  Running mean/var/count live on device;
    the whole forward (experience + normalize) is a single jitted Pallas call.
    """

    def __init__(self, shape, eps=0.01, until=None, clip_threshold=None,
                 update_obs_norm=True):
        if isinstance(shape, int):
            shape = (shape,)
        assert len(shape) == 1, "this port handles feature-vector inputs (B, F)"
        self.in_features = shape[0]
        self.eps = float(eps)
        self.until = until
        self.clip_threshold = None if clip_threshold is None else float(clip_threshold)
        self._is_training = update_obs_norm
        self._mean = jnp.zeros((1, self.in_features), dtype=jnp.float32)
        self._var = jnp.ones((1, self.in_features), dtype=jnp.float32)
        self._count = jnp.zeros((), dtype=jnp.int32)

    @property
    def mean(self):
        return self._mean[0]

    @property
    def std(self):
        return jnp.sqrt(self._var[0])

    @property
    def count(self):
        return int(self._count)

    def inverse(self, y):
        return y * jnp.sqrt(self._var + self.eps) + self._mean

    def __call__(self, x):
        assert x.ndim == 2 and x.shape[1] == self.in_features
        batch = x.shape[0]
        if batch == 0:
            # experience() early-returns on empty batches; nothing to normalize.
            return jnp.zeros_like(x)
        if self._is_training:
            out, self._mean, self._var, self._count = _train_forward(
                x, self._mean, self._var, self._count,
                eps=self.eps, clip_threshold=self.clip_threshold, until=self.until)
        else:
            out = _eval_forward(x, self._mean, self._var,
                                eps=self.eps, clip_threshold=self.clip_threshold)
        return out


# ----------------------------------------------------------------------------
# Pure-JAX reference + self-test
# ----------------------------------------------------------------------------

def _reference_forward(x, mean, var, count, eps, clip_threshold, training):
    """Mirrors the PyTorch forward (experience + normalize)."""
    x = x.astype(jnp.float32)
    if training and x.shape[0] > 0:
        count_x = x.shape[0]
        new_count = count + count_x
        rate = count_x / float(new_count)
        mean_x = jnp.mean(x, axis=0, keepdims=True)
        var_x = jnp.var(x, axis=0, keepdims=True)   # unbiased=False
        delta_mean = mean_x - mean
        mean = mean + rate * delta_mean
        var = var + rate * (var_x - var + delta_mean * (mean_x - mean))
        count = new_count
    normalized = (x - mean) * (var + eps) ** (-0.5)
    if clip_threshold is not None:
        normalized = jnp.clip(normalized, -clip_threshold, clip_threshold)
    return normalized, mean, var, count


if __name__ == "__main__":
    def run_case(B, F, clip_threshold=None, training=True, steps=2, seed=0):
        keys = jax.random.split(jax.random.PRNGKey(seed), steps)
        norm = EmpiricalNormalizationPallas(
            shape=(F,), eps=0.01, until=None,
            clip_threshold=clip_threshold, update_obs_norm=training)
        ref_mean = jnp.zeros((1, F), jnp.float32)
        ref_var = jnp.ones((1, F), jnp.float32)
        ref_count = 0
        for i in range(steps):
            scale = 3.0 if i == 0 else 0.5
            shift = 1.5 if i == 0 else -2.0
            x = jax.random.normal(keys[i], (B, F), jnp.float32) * scale + shift
            y = jax.block_until_ready(norm(x))
            y_ref, ref_mean, ref_var, ref_count = _reference_forward(
                x, ref_mean, ref_var, ref_count, norm.eps, clip_threshold, training)
            assert y.shape == (B, F)
            assert jnp.allclose(y, y_ref, atol=1e-4, rtol=1e-4), \
                f"output mismatch ({B},{F}) step {i}"
            assert jnp.allclose(norm._mean, ref_mean, atol=1e-5, rtol=1e-5), \
                f"mean mismatch ({B},{F}) step {i}"
            assert jnp.allclose(norm._var, ref_var, atol=1e-5, rtol=1e-5), \
                f"var mismatch ({B},{F}) step {i}"
            assert norm.count == ref_count

    # Small shape matching typical observation-normalizer usage (batch=2, hidden=32).
    run_case(2, 32, seed=0)
    # Wider feature dim: multi-tile feature grid (2 tiles on v7x).
    run_case(16, 1024, seed=1)
    # Eval path (no stat update) with clipping — dedicated normalize-only kernel.
    run_case(2, 32, clip_threshold=2.0, training=False, steps=1, seed=2)
    # Ragged feature dim (F % 128 != 0): handled in-kernel via a partial tail
    # tile — no wrapper-side pad/slice copies.
    run_case(8, 200, steps=1, seed=3)
    # Larger batch: MXU-offloaded batch-reduction path.
    run_case(256, 512, steps=1, seed=4)

    print("KERNEL_OK")
</pallas_src>

<mosaic_0001>
module attributes {stable_mosaic.version = 11 : i64} {
  func.func @_train_kernel(%arg0: i32, %arg1: memref<1xf32, #tpu.memory_space<smem>>, %arg2: memref<2x32xf32, #tpu.memory_space<vmem>>, %arg3: memref<1x32xf32, #tpu.memory_space<vmem>>, %arg4: memref<1x32xf32, #tpu.memory_space<vmem>>, %arg5: memref<2x32xf32, #tpu.memory_space<vmem>>, %arg6: memref<1x32xf32, #tpu.memory_space<vmem>>, %arg7: memref<1x32xf32, #tpu.memory_space<vmem>>) attributes {dimension_semantics = [#tpu.dimension_semantics<parallel>], iteration_bounds = array<i64: 1>, scalar_prefetch = 0 : i64, scratch_operands = 0 : i64, tpu.core_type = #tpu.core_type<tc>, window_params = [{transform_indices = @transform_0, window_bounds = array<i64: 1>}, {transform_indices = @transform_1, window_bounds = array<i64: 2, 32>}, {transform_indices = @transform_2, window_bounds = array<i64: 1, 32>}, {transform_indices = @transform_3, window_bounds = array<i64: 1, 32>}, {transform_indices = @transform_4, window_bounds = array<i64: 2, 32>}, {transform_indices = @transform_5, window_bounds = array<i64: 1, 32>}, {transform_indices = @transform_6, window_bounds = array<i64: 1, 32>}]} {
    %c0 = arith.constant 0 : index
    %c0_0 = arith.constant 0 : index
    %0 = vector.load %arg2[%c0, %c0_0] : memref<2x32xf32, #tpu.memory_space<vmem>>, vector<2x32xf32>
    %c0_1 = arith.constant 0 : index
    %c0_2 = arith.constant 0 : index
    %1 = vector.load %arg3[%c0_1, %c0_2] : memref<1x32xf32, #tpu.memory_space<vmem>>, vector<1x32xf32>
    %c0_3 = arith.constant 0 : index
    %c0_4 = arith.constant 0 : index
    %2 = vector.load %arg4[%c0_3, %c0_4] : memref<1x32xf32, #tpu.memory_space<vmem>>, vector<1x32xf32>
    %c0_5 = arith.constant 0 : index
    %3 = memref.load %arg1[%c0_5] : memref<1xf32, #tpu.memory_space<smem>>
    %cst = arith.constant dense<0.000000e+00> : vector<32xf32>
    %4 = vector.multi_reduction <add>, %0, %cst [0] : vector<2x32xf32> to vector<32xf32>
    %5 = vector.shape_cast %4 : vector<32xf32> to vector<1x32xf32>
    %cst_6 = arith.constant 2.000000e+00 : f32
    %6 = vector.broadcast %cst_6 : f32 to vector<1x32xf32>
    %7 = arith.divf %5, %6 : vector<1x32xf32>
    %8 = vector.broadcast %7 : vector<1x32xf32> to vector<2x32xf32>
    %9 = arith.subf %0, %8 : vector<2x32xf32>
    %10 = arith.mulf %9, %9 : vector<2x32xf32>
    %cst_7 = arith.constant dense<0.000000e+00> : vector<32xf32>
    %11 = vector.multi_reduction <add>, %10, %cst_7 [0] : vector<2x32xf32> to vector<32xf32>
    %12 = vector.shape_cast %11 : vector<32xf32> to vector<1x32xf32>
    %cst_8 = arith.constant 2.000000e+00 : f32
    %13 = vector.broadcast %cst_8 : f32 to vector<1x32xf32>
    %14 = arith.divf %12, %13 : vector<1x32xf32>
    %15 = arith.subf %7, %1 : vector<1x32xf32>
    %16 = vector.broadcast %3 : f32 to vector<1x32xf32>
    %17 = arith.mulf %16, %15 : vector<1x32xf32>
    %18 = arith.addf %1, %17 : vector<1x32xf32>
    %19 = arith.subf %14, %2 : vector<1x32xf32>
    %20 = arith.subf %7, %18 : vector<1x32xf32>
    %21 = arith.mulf %15, %20 : vector<1x32xf32>
    %22 = arith.addf %19, %21 : vector<1x32xf32>
    %23 = vector.broadcast %3 : f32 to vector<1x32xf32>
    %24 = arith.mulf %23, %22 : vector<1x32xf32>
    %25 = arith.addf %2, %24 : vector<1x32xf32>
    %c0_9 = arith.constant 0 : index
    %c0_10 = arith.constant 0 : index
    %26 = vector.load %arg6[%c0_9, %c0_10] : memref<1x32xf32, #tpu.memory_space<vmem>>, vector<1x32xf32>
    tpu.vector_store %arg6[%c0_9, %c0_10], %18 {strides = array<i32>} : memref<1x32xf32, #tpu.memory_space<vmem>>, vector<1x32xf32>,
    %c0_11 = arith.constant 0 : index
    %c0_12 = arith.constant 0 : index
    %27 = vector.load %arg7[%c0_11, %c0_12] : memref<1x32xf32, #tpu.memory_space<vmem>>, vector<1x32xf32>
    tpu.vector_store %arg7[%c0_11, %c0_12], %25 {strides = array<i32>} : memref<1x32xf32, #tpu.memory_space<vmem>>, vector<1x32xf32>,
    %cst_13 = arith.constant 0.00999999977 : f32
    %28 = vector.broadcast %cst_13 : f32 to vector<1x32xf32>
    %29 = arith.addf %25, %28 : vector<1x32xf32>
    %30 = math.rsqrt %29 : vector<1x32xf32>
    %31 = vector.broadcast %18 : vector<1x32xf32> to vector<2x32xf32>
    %32 = arith.subf %0, %31 : vector<2x32xf32>
    %33 = vector.broadcast %30 : vector<1x32xf32> to vector<2x32xf32>
    %34 = arith.mulf %32, %33 : vector<2x32xf32>
    %c0_14 = arith.constant 0 : index
    %c0_15 = arith.constant 0 : index
    %35 = vector.load %arg5[%c0_14, %c0_15] : memref<2x32xf32, #tpu.memory_space<vmem>>, vector<2x32xf32>
    tpu.vector_store %arg5[%c0_14, %c0_15], %34 {strides = array<i32>} : memref<2x32xf32, #tpu.memory_space<vmem>>, vector<2x32xf32>,
    return
  }
  func.func @transform_0(%arg0: i32) -> i32 {
    %c0_i32 = arith.constant 0 : i32
    %c0_i32_0 = arith.constant 0 : i32
    return %c0_i32 : i32
  }
  func.func @transform_1(%arg0: i32) -> (i32, i32) {
    %c0_i32 = arith.constant 0 : i32
    %c0_i32_0 = arith.constant 0 : i32
    return %c0_i32, %arg0 : i32, i32
  }
  func.func @transform_2(%arg0: i32) -> (i32, i32) {
    %c0_i32 = arith.constant 0 : i32
    %c0_i32_0 = arith.constant 0 : i32
    return %c0_i32, %arg0 : i32, i32
  }
  func.func @transform_3(%arg0: i32) -> (i32, i32) {
    %c0_i32 = arith.constant 0 : i32
    %c0_i32_0 = arith.constant 0 : i32
    return %c0_i32, %arg0 : i32, i32
  }
  func.func @transform_4(%arg0: i32) -> (i32, i32) {
    %c0_i32 = arith.constant 0 : i32
    %c0_i32_0 = arith.constant 0 : i32
    return %c0_i32, %arg0 : i32, i32
  }
  func.func @transform_5(%arg0: i32) -> (i32, i32) {
    %c0_i32 = arith.constant 0 : i32
    %c0_i32_0 = arith.constant 0 : i32
    return %c0_i32, %arg0 : i32, i32
  }
  func.func @transform_6(%arg0: i32) -> (i32, i32) {
    %c0_i32 = arith.constant 0 : i32
    %c0_i32_0 = arith.constant 0 : i32
    return %c0_i32, %arg0 : i32, i32
  }
}

</mosaic_0001>

<bundles_post_ra>
// kernel: _train_forward.1
= control target key start
LH: loop header
LB: loop body
LE: loop exit
PB: predicated region body
PF: predicated region fallthrough
CT: control target
= control target key end

     0   :  { %vm26_vm0 = vcmask 254976   ;;  %s196_s0 = inlined_call_operand.<no memory space> [shape: f32[1], index: 0, kind: input, shape index: {}]   ;;  %s197_s1 = inlined_call_operand.vmem [shape: f32[2,32], index: 1, kind: input, shape index: {}]   ;;  %s198_s2 = inlined_call_operand.vmem [shape: f32[1,32], index: 2, kind: input, shape index: {}, may-alias: {2,5}]   ;;  %s199_s3 = inlined_call_operand.vmem [shape: f32[1,32], index: 3, kind: input, shape index: {}, may-alias: {3,6}]   ;;  %s200_s4 = inlined_call_operand.hbm [shape: f32[2,32], index: 4, kind: output, shape index: {0}]   ;;  %s201_s5 = inlined_call_operand.vmem [shape: f32[1,32], index: 5, kind: output, shape index: {1}, may-alias: {2,5}]   ;;  %s202_s6 = inlined_call_operand.vmem [shape: f32[1,32], index: 6, kind: output, shape index: {2}, may-alias: {3,6}]  }
   0x1   :  { %v22_v0 = vld [vmem:[%s197_s1] sm:$0x3] }
   0x2   :  { %13 = vsyncpa [#allocation4], 0  ;;  %v27_v1 = vsel %vm26_vm0, %v22_v0, 0.0  ;;  %v23_v8 = vld [vmem:[%s198_s2] sm:$0x1]  ;;  %v47_v10 = vstv %s196_s0  ;;  %vm56_vm1 = vcmask 253952   ;;  %v62_v29 = vlaneseq }
   0x3   :  { %v28_v2 = vrot.slane %v27_v1, 4  ;;  %v24_v24 = vld [vmem:[%s199_s3] sm:$0x1]  ;;  %s125_s3 = smov [#allocation3]  }
   0x4   :  { %v63_v32 = vshrl.u32 %v62_v29, 7  ;;  %s82_s29 = sshll.u32 %s125_s3, 4  ;;  %s83_s29 = int_to_ptr.vmem [resolvable:$true] %s82_s29 }
   0x5   :  { %v29_v3 = vadd.f32 %v28_v2, %v27_v1  ;;  %s101_s30 = scalar_lea.vmem %s83_s29, 32  ;;  %p106_p1 = scmp.lt.s32.totalorder %s83_s29, %s83_s29 }
   0x6   :  { %v64_v34 = vsub.s32 0, %v63_v32  ;;  %p102_p0 = scmp.ne.s32.totalorder %s83_s29, %s101_s30  ;;  %p107_p2 = scmp.lt.s32.totalorder %s101_s30, %s101_s30 }
   0x7   :  { %v30_v4 = vrot.slane %v29_v3, 2 }
   0x8   :  { %p108_p3 = por %p107_p2, %p106_p1 }
   0x9   :  { %v31_v5 = vadd.f32 %v30_v4, %v29_v3 }
   0xa   :  { %p109_p4 = pnand %p108_p3, %p102_p0 }
   0xb   :  { %v32_v6 = vrot.slane %v31_v5, 1 }
   0xd   :  { %v33_v7 = vadd.f32 %v32_v6, %v31_v5 }
   0xf   :  { %v35_v9 = vmul.f32 0.5, %v33_v7 }
  0x11   :  { %v36_v11 = vsub.f32 %v22_v0, %v35_v9  ;;  %v46_v12 = vsub.f32 %v35_v9, %v23_v8 }
  0x13   :  { %v37_v13 = vmul.f32 %v36_v11, %v36_v11  ;;  %v48_v14 = vmul.f32 %v47_v10, %v46_v12 }
  0x15   :  { %v38_v15 = vsel %vm26_vm0, %v37_v13, 0.0  ;;  %v49_v16 = vadd.f32 %v48_v14, %v23_v8 }
  0x16   :  { %v39_v17 = vrot.slane %v38_v15, 4 }
  0x17   :  { %57 = vst.msk [vmem:[%s201_s5] sm:$0x1] %vm56_vm1, %v49_v16  ;;  %v51_v22 = vsub.f32 %v35_v9, %v49_v16  ;;  %v65_v35 = vrot.slane %v49_v16, %v64_v34 }
  0x18   :  { %v40_v18 = vadd.f32 %v39_v17, %v38_v15 }
  0x19   :  { %v52_v26 = vmul.f32 %v51_v22, %v46_v12  ;;  %v67_v36 = vsub.f32 %v22_v0, %v65_v35 }
  0x1a   :  { %v41_v19 = vrot.slane %v40_v18, 2 }
  0x1c   :  { %v42_v20 = vadd.f32 %v41_v19, %v40_v18 }
  0x1e   :  { %v43_v21 = vrot.slane %v42_v20, 1 }
  0x20   :  { %v44_v23 = vadd.f32 %v43_v21, %v42_v20 }
  0x22   :  { %v45_v25 = vmul.f32 0.5, %v44_v23 }
  0x24   :  { %v50_v27 = vsub.f32 %v45_v25, %v24_v24 }
  0x26   :  { %v53_v28 = vadd.f32 %v52_v26, %v50_v27 }
  0x28   :  { %v54_v30 = vmul.f32 %v53_v28, %v47_v10 }
  0x2a   :  { %v55_v31 = vadd.f32 %v54_v30, %v24_v24 }
  0x2c   :  { %v59_v33 = vadd.f32 0.01, %v55_v31  ;;  %58 = vst.msk [vmem:[%s202_s6] sm:$0x1] %vm56_vm1, %v55_v31 }
  0x2e   :  { %99 = vrsqrt.f32 %v59_v33 }
  0x38   :  { %v100_v37 = vpop.eup %99 }
  0x39   :  { %v72_v38 = vrot.slane %v100_v37, %v64_v34 }
  0x3b   :  { %v74_v39 = vmul.f32 %v72_v38, %v67_v36 }
  0x3d   :  { %75 = vst.msk [vmem:[#allocation3] sm:$0x3] %vm26_vm0, %v74_v39 }
  0x3e   :  { %112 = shalt.err (!%p109_p4)
}
  0x3f   :  { %s113_s8 = scalar_lea.hbm %s200_s4, 32 }
  0x40   :  { %p114_p5 = scmp.ne.s32.totalorder %s200_s4, %s113_s8  ;;  %p117_p6 = scmp.lt.u32.totalorder %s113_s8, %s200_s4 }
  0x42   :  { %p119_p7 = pnand %p117_p6, %p114_p5 }
  0x44   :  { %122 = shalt.err (!%p119_p7)
}
  0x45   :  { %85 = dma.vmem_to_hbm [thread:$0]  %s83_s29, 32, %s200_s4, [#allocation4]  }
  0x46   :  { %123 = dma.done.wait [#allocation4], 32  }
  0x47   :  { %124 = vsyncadd [#allocation4], 4294967264 }
  0x48   :  { %97 = vsyncpa [#allocation4], 1 }

</bundles_post_ra>
